<compile_context>
chip_gen: v7x
topology: tpu7x:2x2x1
jax: 0.10.0
libtpu: 0.0.40
codegen_flags: <defaults>
</compile_context>

<pallas_src>
import jax
import jax.numpy as jnp
from jax import lax
from jax.experimental import pallas as pl
from jax.experimental.pallas import tpu as pltpu

KSIZE = 3  # module defaults: kernel_size=3, stride=1, same=True

# Conservative per-step VMEM budget: fits v7x (64 MiB physical, 32 MiB scoped
# default) with headroom; v5e/v6e have 128 MiB physical.
_VMEM_BUDGET = 20 << 20


def _win3_min(prev, above, below):
    """Separable 3x3 window-min of `prev` (TH, W).

    `above` / `below` are (1, W) halo rows: the neighbouring tile's edge row,
    or a replicate of the image-edge row at the border (replicate == reflect
    for a 3-tap min).  Column borders use replicate for the same reason.
    Shifts run on the XLU via pltpu.roll; edge fixups are iota masks (VPU).
    """
    TH, W = prev.shape
    rows = lax.broadcasted_iota(jnp.int32, (TH, W), 0)
    cols = lax.broadcasted_iota(jnp.int32, (TH, W), 1)

    up = pltpu.roll(prev, shift=1, axis=0)         # row r <- prev[r-1] (wraps at 0)
    up = jnp.where(rows == 0, above, up)           # supply halo row
    dn = pltpu.roll(prev, shift=TH - 1, axis=0)    # row r <- prev[r+1] (wraps at TH-1)
    dn = jnp.where(rows == TH - 1, below, dn)
    v = jnp.minimum(jnp.minimum(prev, up), dn)     # vertical 3-tap

    lf = pltpu.roll(v, shift=1, axis=1)            # col c <- v[c-1] (wraps at 0)
    lf = jnp.where(cols == 0, v, lf)               # replicate == reflect
    rt = pltpu.roll(v, shift=W - 1, axis=1)        # col c <- v[c+1] (wraps at W-1)
    rt = jnp.where(cols == W - 1, v, rt)
    return jnp.minimum(jnp.minimum(v, lf), rt)     # horizontal 3-tap


def _dcp_kernel(x_ref, o_ref, cmin_prev, row_above):
    """Grid = (N, n_h + 1); step (n, h) emits the output for tile h-1 of image n.

    x_ref     : (1, C, TH, W)  input tile min(h, n_h-1) of image n
    o_ref     : (1, TH, W)     output tile max(h-1, 0) of image n
    cmin_prev : VMEM (TH, W)   channel-min of the previous step's input tile
    row_above : VMEM (1, W)    last channel-min row of the tile before that
    """
    h = pl.program_id(1)
    n_h = pl.num_programs(1) - 1          # number of real H tiles
    TH = o_ref.shape[1]

    def emit(below):
        # NOTE: the h=0 output block is never written by the kernel; it shares
        # the resident VMEM buffer with the h=1 block (same block index), which
        # IS written before any writeback, so no garbage is ever flushed.
        prev = cmin_prev[...]
        # "Above" halo of the tile being emitted: replicate at the image top
        # (== reflect for a 3-tap min), carried row otherwise.
        above = jnp.where(h == 1, prev[0:1, :], row_above[...])
        o_ref[0] = _win3_min(prev, above, below).astype(o_ref.dtype)

    @pl.when(h < n_h)
    def _():
        # Only place all C channels are touched; kept in the input dtype
        # (min is exact in any dtype).
        cmin_cur = jnp.min(x_ref[0], axis=0)            # (TH, W)

        @pl.when(h > 0)
        def _():
            emit(cmin_cur[0:1, :])                      # "below" halo of tile h-1

        # Update carries for the next step (read cmin_prev before overwriting).
        row_above[...] = cmin_prev[TH - 1:TH, :]
        cmin_prev[...] = cmin_cur

    @pl.when(h == n_h)
    def _():
        # Flush step: emit the last tile; its "below" halo is the image border
        # (replicate of its last row).  No channel-min recompute, no carries.
        emit(cmin_prev[TH - 1:TH, :])


def _block_bytes(C, th, W, in_item, out_item):
    in_blk = C * th * W * in_item                  # one (1, C, TH, W) input tile
    out_blk = th * W * out_item                    # one (1, TH, W) output tile
    scratch = (th + 1) * W * in_item               # cmin_prev + row_above carries
    return 2 * in_blk + 2 * out_blk + scratch      # double-buffered in/out


def _pick_tile_h(C, H, W, in_item, out_item, budget=_VMEM_BUDGET):
    """Largest TH fitting the VMEM byte budget.

    TH must be a multiple of 8 (sublane tiling) or equal the full H extent.
    If nothing fits the budget, fall back to the smallest legal TH (the
    explicit vmem_limit_bytes then covers the overshoot when possible).
    """
    cands = [th for th in range(8, H, 8) if H % th == 0] + [H]
    fitting = [th for th in cands if _block_bytes(C, th, W, in_item, out_item) <= budget]
    return max(fitting) if fitting else min(cands)


def dcp_forward(x, *, tile_h=None):
    """x: (N, C, H, W) -> (N, H, W): 3x3 reflect-padded window min + channel min."""
    N, C, H, W = x.shape
    if H < 2 or W < 2:
        raise ValueError("reflect padding requires H >= 2 and W >= 2")

    in_item = jnp.dtype(x.dtype).itemsize
    out_item = in_item
    if tile_h is None:
        tile_h = _pick_tile_h(C, H, W, in_item, out_item)
    if H % tile_h != 0 or not (tile_h == H or tile_h % 8 == 0):
        raise ValueError(
            f"tile_h={tile_h} must divide H={H} and be a multiple of 8 (or equal H)")
    n_h = H // tile_h

    needed = _block_bytes(C, tile_h, W, in_item, out_item)
    vmem_limit = int(min(max(2 * needed, 32 << 20), 64 << 20))

    cost = pl.CostEstimate(
        flops=N * H * W * (C - 1 + 4),             # compare ops (channel min + separable 3x3)
        transcendentals=0,
        bytes_accessed=in_item * N * C * H * W + out_item * N * H * W,
    )

    # Perf notes (layout-level, left to the caller):
    #  * W maps to the 128-lane axis; W not a multiple of 128 means lane-masked
    #    stores.  For full lane density pad W to a multiple of 128 outside and
    #    slice the result.
    #  * On 2-TensorCore chips (v7x) with N == 1 the single "parallel" axis
    #    leaves one core idle; add a second parallel split if that matters.
    #  * For large C (feature maps), move the channel reduction onto its own
    #    "arbitrary" grid axis so TH can stay large independent of C.

    return pl.pallas_call(
        _dcp_kernel,
        out_shape=jax.ShapeDtypeStruct((N, H, W), x.dtype),
        grid_spec=pltpu.PrefetchScalarGridSpec(
            num_scalar_prefetch=0,
            # One extra (flush) step along H: step h emits output tile h-1.
            grid=(N, n_h + 1),
            in_specs=[pl.BlockSpec(
                (1, C, tile_h, W),
                # Clamp at the flush step: same block index as the previous
                # step, so the pipeline does not re-fetch anything.
                lambda n, h: (n, 0, jnp.minimum(h, n_h - 1), 0))],
            out_specs=pl.BlockSpec(
                (1, tile_h, W),
                # h=0 maps to the same (resident) block as h=1; it is only
                # written (and written back) once real data is available.
                lambda n, h: (n, jnp.maximum(h - 1, 0), 0)),
            scratch_shapes=[
                pltpu.VMEM((tile_h, W), x.dtype),   # channel-min of previous tile
                pltpu.VMEM((1, W), x.dtype),        # its "row above" halo
            ],
        ),
        compiler_params=pltpu.CompilerParams(
            dimension_semantics=("parallel", "arbitrary"),
            vmem_limit_bytes=vmem_limit),
        cost_estimate=cost,
    )(x)


def dcp_reference(x):
    """Pure-JAX reference mirroring the PyTorch forward."""
    x_pad = jnp.pad(x, ((0, 0), (0, 0), (1, 1), (1, 1)), mode="reflect")
    N, C, H, W = x.shape
    vals = []
    for di in range(KSIZE):
        for dj in range(KSIZE):
            vals.append(x_pad[:, :, di:di + H, dj:dj + W])
    stacked = jnp.stack(vals, axis=-1)                  # (N, C, H, W, 9)
    return jnp.min(jnp.min(stacked, axis=-1), axis=1)   # (N, H, W)


if __name__ == "__main__":
    key = jax.random.PRNGKey(0)
    N, C, H, W = 2, 4, 16, 16
    x = jax.random.normal(key, (N, C, H, W), dtype=jnp.float32)

    ref = dcp_reference(x)

    # tile_h=8 -> 2 H-tiles per image: exercises the cross-tile halo carry path.
    out = jax.block_until_ready(dcp_forward(x, tile_h=8))
    assert out.shape == (N, H, W), out.shape
    assert jnp.allclose(out, ref, atol=1e-6), "mismatch vs reference (tile_h=8)"

    # Auto tile selection (picks TH=H here) -> exercises the single-tile flush path.
    out2 = jax.block_until_ready(dcp_forward(x))
    assert jnp.allclose(out2, ref, atol=1e-6), "mismatch vs reference (auto tile)"

    print("KERNEL_OK")
</pallas_src>

<mosaic_0001>
module attributes {stable_mosaic.version = 11 : i64} {
  func.func @_dcp_kernel(%arg0: i32, %arg1: i32, %arg2: memref<1x4x8x16xf32, #tpu.memory_space<vmem>>, %arg3: memref<1x8x16xf32, #tpu.memory_space<vmem>>, %arg4: memref<8x16xf32, #tpu.memory_space<vmem>>, %arg5: memref<1x16xf32, #tpu.memory_space<vmem>>) attributes {dimension_semantics = [#tpu.dimension_semantics<parallel>, #tpu.dimension_semantics<arbitrary>], iteration_bounds = array<i64: 2, 3>, scalar_prefetch = 0 : i64, scratch_operands = 2 : i64, tpu.core_type = #tpu.core_type<tc>, window_params = [{transform_indices = @transform_0, window_bounds = array<i64: 1, 4, 8, 16>}, {transform_indices = @transform_1, window_bounds = array<i64: 1, 8, 16>}]} {
    %c2_i32 = arith.constant 2 : i32
    %0 = arith.cmpi slt, %arg1, %c2_i32 : i32
    %1 = arith.extui %0 : i1 to i32
    %c0_i32 = arith.constant 0 : i32
    %2 = arith.cmpi ne, %1, %c0_i32 : i32
    scf.if %2 {
      %c0 = arith.constant 0 : index
      %c0_2 = arith.constant 0 : index
      %c0_3 = arith.constant 0 : index
      %c0_4 = arith.constant 0 : index
      %6 = vector.load %arg2[%c0, %c0_2, %c0_3, %c0_4] : memref<1x4x8x16xf32, #tpu.memory_space<vmem>>, vector<1x4x8x16xf32>
      %7 = vector.shape_cast %6 : vector<1x4x8x16xf32> to vector<4x8x16xf32>
      %cst = arith.constant dense<0x7F800000> : vector<8x16xf32>
      %8 = vector.multi_reduction <minimumf>, %7, %cst [0] : vector<4x8x16xf32> to vector<8x16xf32>
      %c0_i32_5 = arith.constant 0 : i32
      %9 = arith.cmpi sgt, %arg1, %c0_i32_5 : i32
      %10 = arith.extui %9 : i1 to i32
      %c0_i32_6 = arith.constant 0 : i32
      %11 = arith.cmpi ne, %10, %c0_i32_6 : i32
      scf.if %11 {
        %15 = vector.extract_strided_slice %8 {offsets = [0, 0], sizes = [1, 16], strides = [1, 1]} : vector<8x16xf32> to vector<1x16xf32>
        %c0_12 = arith.constant 0 : index
        %c0_13 = arith.constant 0 : index
        %16 = vector.load %arg4[%c0_12, %c0_13] : memref<8x16xf32, #tpu.memory_space<vmem>>, vector<8x16xf32>
        %c1_i32 = arith.constant 1 : i32
        %17 = arith.cmpi eq, %arg1, %c1_i32 : i32
        %18 = vector.extract_strided_slice %16 {offsets = [0, 0], sizes = [1, 16], strides = [1, 1]} : vector<8x16xf32> to vector<1x16xf32>
        %c0_14 = arith.constant 0 : index
        %c0_15 = arith.constant 0 : index
        %19 = vector.load %arg5[%c0_14, %c0_15] : memref<1x16xf32, #tpu.memory_space<vmem>>, vector<1x16xf32>
        %20 = arith.select %17, %18, %19 : vector<1x16xf32>
        %21 = tpu.iota {dimensions = array<i32: 0>} : vector<8x16xi32>
        %22 = tpu.iota {dimensions = array<i32: 1>} : vector<8x16xi32>
        %c1_i32_16 = arith.constant 1 : i32
        %23 = tpu.dynamic_rotate %16 by %c1_i32_16 dim 0 : vector<8x16xf32>, i32 -> vector<8x16xf32>
        %c0_i32_17 = arith.constant 0 : i32
        %24 = vector.broadcast %c0_i32_17 : i32 to vector<8x16xi32>
        %25 = arith.cmpi eq, %21, %24 : vector<8x16xi32>
        %26 = vector.shape_cast %20 : vector<1x16xf32> to vector<1x16xf32>
        %27 = vector.broadcast %26 : vector<1x16xf32> to vector<8x16xf32>
        %28 = arith.select %25, %27, %23 : vector<8x16xi1>, vector<8x16xf32>
        %c7_i32 = arith.constant 7 : i32
        %29 = tpu.dynamic_rotate %16 by %c7_i32 dim 0 : vector<8x16xf32>, i32 -> vector<8x16xf32>
        %c7_i32_18 = arith.constant 7 : i32
        %30 = vector.broadcast %c7_i32_18 : i32 to vector<8x16xi32>
        %31 = arith.cmpi eq, %21, %30 : vector<8x16xi32>
        %32 = vector.shape_cast %15 : vector<1x16xf32> to vector<1x16xf32>
        %33 = vector.broadcast %32 : vector<1x16xf32> to vector<8x16xf32>
        %34 = arith.select %31, %33, %29 : vector<8x16xi1>, vector<8x16xf32>
        %35 = arith.minimumf %16, %28 : vector<8x16xf32>
        %36 = arith.minimumf %35, %34 : vector<8x16xf32>
        %c1_i32_19 = arith.constant 1 : i32
        %37 = tpu.dynamic_rotate %36 by %c1_i32_19 dim 1 : vector<8x16xf32>, i32 -> vector<8x16xf32>
        %c0_i32_20 = arith.constant 0 : i32
        %38 = vector.broadcast %c0_i32_20 : i32 to vector<8x16xi32>
        %39 = arith.cmpi eq, %22, %38 : vector<8x16xi32>
        %40 = arith.select %39, %36, %37 : vector<8x16xi1>, vector<8x16xf32>
        %c15_i32 = arith.constant 15 : i32
        %41 = tpu.dynamic_rotate %36 by %c15_i32 dim 1 : vector<8x16xf32>, i32 -> vector<8x16xf32>
        %c15_i32_21 = arith.constant 15 : i32
        %42 = vector.broadcast %c15_i32_21 : i32 to vector<8x16xi32>
        %43 = arith.cmpi eq, %22, %42 : vector<8x16xi32>
        %44 = arith.select %43, %36, %41 : vector<8x16xi1>, vector<8x16xf32>
        %45 = arith.minimumf %36, %40 : vector<8x16xf32>
        %46 = arith.minimumf %45, %44 : vector<8x16xf32>
        %c0_22 = arith.constant 0 : index
        %c0_23 = arith.constant 0 : index
        %c0_24 = arith.constant 0 : index
        %47 = vector.load %arg3[%c0_22, %c0_23, %c0_24] : memref<1x8x16xf32, #tpu.memory_space<vmem>>, vector<1x8x16xf32>
        %48 = vector.shape_cast %47 : vector<1x8x16xf32> to vector<8x16xf32>
        %49 = vector.shape_cast %46 : vector<8x16xf32> to vector<1x8x16xf32>
        tpu.vector_store %arg3[%c0_22, %c0_23, %c0_24], %49 {strides = array<i32>} : memref<1x8x16xf32, #tpu.memory_space<vmem>>, vector<1x8x16xf32>,
      } else {
      }
      %c7 = arith.constant 7 : index
      %c0_7 = arith.constant 0 : index
      %12 = vector.load %arg4[%c7, %c0_7] : memref<8x16xf32, #tpu.memory_space<vmem>>, vector<1x16xf32>
      %c0_8 = arith.constant 0 : index
      %c0_9 = arith.constant 0 : index
      %13 = vector.load %arg5[%c0_8, %c0_9] : memref<1x16xf32, #tpu.memory_space<vmem>>, vector<1x16xf32>
      tpu.vector_store %arg5[%c0_8, %c0_9], %12 {strides = array<i32>} : memref<1x16xf32, #tpu.memory_space<vmem>>, vector<1x16xf32>,
      %c0_10 = arith.constant 0 : index
      %c0_11 = arith.constant 0 : index
      %14 = vector.load %arg4[%c0_10, %c0_11] : memref<8x16xf32, #tpu.memory_space<vmem>>, vector<8x16xf32>
      tpu.vector_store %arg4[%c0_10, %c0_11], %8 {strides = array<i32>} : memref<8x16xf32, #tpu.memory_space<vmem>>, vector<8x16xf32>,
    } else {
    }
    %c2_i32_0 = arith.constant 2 : i32
    %3 = arith.cmpi eq, %arg1, %c2_i32_0 : i32
    %4 = arith.extui %3 : i1 to i32
    %c0_i32_1 = arith.constant 0 : i32
    %5 = arith.cmpi ne, %4, %c0_i32_1 : i32
    scf.if %5 {
      %c7 = arith.constant 7 : index
      %c0 = arith.constant 0 : index
      %6 = vector.load %arg4[%c7, %c0] : memref<8x16xf32, #tpu.memory_space<vmem>>, vector<1x16xf32>
      %c0_2 = arith.constant 0 : index
      %c0_3 = arith.constant 0 : index
      %7 = vector.load %arg4[%c0_2, %c0_3] : memref<8x16xf32, #tpu.memory_space<vmem>>, vector<8x16xf32>
      %c1_i32 = arith.constant 1 : i32
      %8 = arith.cmpi eq, %arg1, %c1_i32 : i32
      %9 = vector.extract_strided_slice %7 {offsets = [0, 0], sizes = [1, 16], strides = [1, 1]} : vector<8x16xf32> to vector<1x16xf32>
      %c0_4 = arith.constant 0 : index
      %c0_5 = arith.constant 0 : index
      %10 = vector.load %arg5[%c0_4, %c0_5] : memref<1x16xf32, #tpu.memory_space<vmem>>, vector<1x16xf32>
      %11 = arith.select %8, %9, %10 : vector<1x16xf32>
      %12 = tpu.iota {dimensions = array<i32: 0>} : vector<8x16xi32>
      %13 = tpu.iota {dimensions = array<i32: 1>} : vector<8x16xi32>
      %c1_i32_6 = arith.constant 1 : i32
      %14 = tpu.dynamic_rotate %7 by %c1_i32_6 dim 0 : vector<8x16xf32>, i32 -> vector<8x16xf32>
      %c0_i32_7 = arith.constant 0 : i32
      %15 = vector.broadcast %c0_i32_7 : i32 to vector<8x16xi32>
      %16 = arith.cmpi eq, %12, %15 : vector<8x16xi32>
      %17 = vector.shape_cast %11 : vector<1x16xf32> to vector<1x16xf32>
      %18 = vector.broadcast %17 : vector<1x16xf32> to vector<8x16xf32>
      %19 = arith.select %16, %18, %14 : vector<8x16xi1>, vector<8x16xf32>
      %c7_i32 = arith.constant 7 : i32
      %20 = tpu.dynamic_rotate %7 by %c7_i32 dim 0 : vector<8x16xf32>, i32 -> vector<8x16xf32>
      %c7_i32_8 = arith.constant 7 : i32
      %21 = vector.broadcast %c7_i32_8 : i32 to vector<8x16xi32>
      %22 = arith.cmpi eq, %12, %21 : vector<8x16xi32>
      %23 = vector.shape_cast %6 : vector<1x16xf32> to vector<1x16xf32>
      %24 = vector.broadcast %23 : vector<1x16xf32> to vector<8x16xf32>
      %25 = arith.select %22, %24, %20 : vector<8x16xi1>, vector<8x16xf32>
      %26 = arith.minimumf %7, %19 : vector<8x16xf32>
      %27 = arith.minimumf %26, %25 : vector<8x16xf32>
      %c1_i32_9 = arith.constant 1 : i32
      %28 = tpu.dynamic_rotate %27 by %c1_i32_9 dim 1 : vector<8x16xf32>, i32 -> vector<8x16xf32>
      %c0_i32_10 = arith.constant 0 : i32
      %29 = vector.broadcast %c0_i32_10 : i32 to vector<8x16xi32>
      %30 = arith.cmpi eq, %13, %29 : vector<8x16xi32>
      %31 = arith.select %30, %27, %28 : vector<8x16xi1>, vector<8x16xf32>
      %c15_i32 = arith.constant 15 : i32
      %32 = tpu.dynamic_rotate %27 by %c15_i32 dim 1 : vector<8x16xf32>, i32 -> vector<8x16xf32>
      %c15_i32_11 = arith.constant 15 : i32
      %33 = vector.broadcast %c15_i32_11 : i32 to vector<8x16xi32>
      %34 = arith.cmpi eq, %13, %33 : vector<8x16xi32>
      %35 = arith.select %34, %27, %32 : vector<8x16xi1>, vector<8x16xf32>
      %36 = arith.minimumf %27, %31 : vector<8x16xf32>
      %37 = arith.minimumf %36, %35 : vector<8x16xf32>
      %c0_12 = arith.constant 0 : index
      %c0_13 = arith.constant 0 : index
      %c0_14 = arith.constant 0 : index
      %38 = vector.load %arg3[%c0_12, %c0_13, %c0_14] : memref<1x8x16xf32, #tpu.memory_space<vmem>>, vector<1x8x16xf32>
      %39 = vector.shape_cast %38 : vector<1x8x16xf32> to vector<8x16xf32>
      %40 = vector.shape_cast %37 : vector<8x16xf32> to vector<1x8x16xf32>
      tpu.vector_store %arg3[%c0_12, %c0_13, %c0_14], %40 {strides = array<i32>} : memref<1x8x16xf32, #tpu.memory_space<vmem>>, vector<1x8x16xf32>,
    } else {
    }
    return
  }
  func.func @transform_0(%arg0: i32, %arg1: i32) -> (i32, i32, i32, i32) {
    %c1_i32 = arith.constant 1 : i32
    %0 = arith.minsi %arg1, %c1_i32 : i32
    %c0_i32 = arith.constant 0 : i32
    %c0_i32_0 = arith.constant 0 : i32
    %c0_i32_1 = arith.constant 0 : i32
    return %arg0, %c0_i32, %0, %c0_i32_0 : i32, i32, i32, i32
  }
  func.func @transform_1(%arg0: i32, %arg1: i32) -> (i32, i32, i32) {
    %c1_i32 = arith.constant 1 : i32
    %0 = arith.subi %arg1, %c1_i32 : i32
    %c0_i32 = arith.constant 0 : i32
    %1 = arith.maxsi %0, %c0_i32 : i32
    %c0_i32_0 = arith.constant 0 : i32
    %c0_i32_1 = arith.constant 0 : i32
    return %arg0, %1, %c0_i32_0 : i32, i32, i32
  }
}

</mosaic_0001>

<bundles_post_ra>
// kernel: tpu_custom_call.1
= control target key start
LH: loop header
LB: loop body
LE: loop exit
PB: predicated region body
PF: predicated region fallthrough
CT: control target
= control target key end

     0   :  { %6 = vsyncpa [#allocation5], 0  ;;  %s954_s0 = inlined_call_operand.hbm [shape: f32[2,4,16,16], index: 0, kind: input, shape index: {}]   ;;  %s955_s1 = inlined_call_operand.hbm [shape: f32[2,16,16], index: 1, kind: output, shape index: {}]  }
   0x1   :  { %8 = vsyncpa [#allocation5 + $0x1], 0 }
   0x2   :  { %9 = vsyncpa [#allocation6], 0 }
   0x3   :  { %11 = vsyncpa [#allocation6 + $0x1], 0  ;;  %s707_s6 = smov 0   ;;  %s709_s7 = smov 0  }
   0x4   :  { %s711_s8 = smov 0   ;;  %s713_s9 = smov 0  }
   0x5   :  { %s715_s10 = smov 0   ;;  %s717_s11 = smov 0  }
   0x6   :  { %s719_s12 = smov 0   ;;  %s721_s13 = smov 0  }
   0x7   :  { %s723_s14 = smov 0   ;;  %s725_s15 = smov 0  }
   0x8   :  { %s727_s16 = smov 0  }
   0x9 LB: > { %960 = sst [smem:[#allocation10_spill]] %s676_s14  ;;  %s399_s17 = sadd.s32 4294967295, %s684_s16   ;;  %s684_s16 = sphi %s727_s16, %s17_s16   ;;  %s680_s15 = sphi %s725_s15, %s982_s15   ;;  %s676_s14 = sphi %s723_s14, %s973_s14   ;;  %s672_s13 = sphi %s721_s13, %s981_s13   ;;  %s668_s12 = sphi %s719_s12, %s972_s12   ;;  %s664_s11 = sphi %s717_s11, %s980_s11   ;;  %s660_s10 = sphi %s715_s10, %s979_s10   ;;  %s656_s9 = sphi %s713_s9, %s978_s9   ;;  %s652_s8 = sphi %s711_s8, %s977_s8   ;;  %s648_s7 = sphi %s709_s7, %s976_s7   ;;  %s644_s6 = sphi %s707_s6, %s975_s6  }
   0xa   : > { %s400_s18 = sadd.s32 4294967294, %s684_s16   ;;  %s26_s19 = sadd.s32 1, %s676_s14 }
   0xb   : > { %s29_s20 = sadd.s32 1, %s680_s15  ;;  %p27_p0 = scmp.ge.s32.totalorder %s26_s19, 3 }
   0xc   : > { %p33_p1 = scmp.lt.s32.totalorder %s676_s14, 1  ;;  %s42_s21 = sadd.s32 1, %s664_s11 }
   0xd   : > { %p49_p2 = scmp.ne.s32.totalorder %s664_s11, %s660_s10  ;;  %s984_s19 = smov (%p27_p0, %s26_s19), 0 }
   0xe   : > { %961 = sst [smem:[#allocation11_spill]] %s984_s19  ;;  %s986_s20 = smov (!%p27_p0, %s29_s20), %s680_s15 }
   0xf   : > { %s774_s22 = scalar_select %p33_p1, %s676_s14, 1 }
  0x10   : > { %p31_p3 = scmp.ge.s32.totalorder %s986_s20, 2  ;;  %p35_p4 = scmp.lt.s32.totalorder %s984_s19, 1 }
  0x11   : > { %p50_p5 = scmp.eq.s32.totalorder %s684_s16, 0  ;;  %p55_p6 = scmp.ne.s32.totalorder %s660_s10, %s656_s9 }
  0x12   : > { %s988_s20 = smov (%p31_p3, %s986_s20), 0  ;;  %p56_p8 = scmp.eq.s32.totalorder %s399_s17, 0 }
  0x13   : > { %962 = sst [smem:[#allocation12_spill]] %s988_s20  ;;  %s37_s24 = ssub.s32 %s680_s15, %s988_s20 }
  0x14   : > { %s36_s23 = scalar_select %p35_p4, %s984_s19, 1 }
  0x15   : > { %p785_p7 = por %p50_p5, %p49_p2  ;;  %s401_s28 = sadd.s32 4294967295, %s676_s14 }
  0x16   : > { %s38_s26 = ssub.s32 %s774_s22, %s36_s23  ;;  %p793_p10 = por %p56_p8, %p55_p6 }
  0x17   : > { %s39_s27 = sor.u32 %s38_s26, %s37_s24  ;;  %p66_p11 = scmp.gt.s32.totalorder %s401_s28, 0 }
  0x18   : > { %p40_p9 = scmp.eq.s32.totalorder %s39_s27, 0  ;;  %s402_s30 = sadd.s32 4294967295, %s984_s19 }
  0x19   : > { %s990_s28 = smov (!%p66_p11, %s401_s28), 0  ;;  %p69_p12 = scmp.gt.s32.totalorder %s402_s30, 0 }
  0x1a   : > { %s799_s2 = scalar_select %p40_p9, %s664_s11, %s42_s21  }
  0x1b   : > { %s76_s3 = sadd.s32 1, %s652_s8  ;;  %p86_p13 = scmp.ne.s32.totalorder %s652_s8, %s648_s7 }
  0x1c   : > { %965 = sst [smem:[#allocation13_spill]] %s799_s2  ;;  %p87_p0 = scmp.eq.s32.totalorder %s399_s17, 5 }
  0x1d   : > { %s992_s30 = smov (!%p69_p12, %s402_s30), 0  ;;  %p92_p2 = scmp.ne.s32.totalorder %s648_s7, %s644_s6 }
  0x1e   : > { %p806_p1 = por %p87_p0, %p86_p13  ;;  %s72_s5 = ssub.s32 %s990_s28, %s992_s30 }
  0x1f   : > { %p93_p3 = scmp.eq.s32.totalorder %s400_s18, 5  ;;  %s73_s9 = sor.u32 %s72_s5, %s37_s24 }
  0x20   : > { %s966_s4 = scalar_select %p806_p1, 1, 0 }
  0x21   : > { %p74_p4 = scmp.eq.s32.totalorder %s73_s9, 0  ;;  %p814_p5 = por %p93_p3, %p92_p2 }
  0x22   : > { %p433_p6 = scmp.lt.s32.totalorder %s684_s16, 6  ;;  %s113_s23 = sand.u32 1, %s664_s11  }
  0x23   : > { %s967_s21 = scalar_select %p814_p5, 1, 0 }
  0x24   : > { %s821_s26 = scalar_select %p74_p4, %s652_s8, %s76_s3  }
  0x25   : > { %s405_s17 = sshll.u32 %s113_s23, 5  ;;  %s406_s27 = sshll.u32 %s680_s15, 3 }
  0x26   : > { %s124_s20 = sadd.s32 %s406_s27, %s774_s22  ;;  %s117_s19 = scalar_lea.vmem [#allocation4], %s405_s17 }
  0x27   : > { %s127_s14 = sshll.u32 %s117_s19, 4  ;;  %s407_s2 = sshll.u32 %s124_s20, 7  ;;  %s825_s14 = int_to_ptr.vmem [resolvable:$true] %s127_s14 }
  0x28   : > { %s830_s24 = scalar_lea.hbm %s954_s0, %s407_s2  ;;  %p834_p8 = pnand %p433_p6, %p785_p7 }
  0x29   : > { %s838_s19 = scalar_lea.sflag [#allocation5], %s113_s23  ;;  %s532_s20 = scalar_lea.hbm %s830_s24, 512 }
  0x2a   : > { %p533_p9 = scmp.ne.s32.totalorder %s830_s24, %s532_s20  ;;  %p534_p11 = pneg %p834_p8 }
  0x2b   : > { %s537_s2 = scalar_lea.hbm %s954_s0, 2048  ;;  %p538_p7 = scmp.lt.u32.totalorder %s830_s24, %s954_s0 }
  0x2c   : > { %p535_p12 = pnand %p534_p11, %p533_p9  ;;  %p539_p0 = scmp.lt.u32.totalorder %s537_s2, %s532_s20 }
  0x2d   : > { %p541_p3 = scmp.lt.u32.totalorder %s532_s20, %s830_s24 }
  0x2e   : > { %p536_p13 = pneg %p535_p12  ;;  %p540_p2 = por %p539_p0, %p538_p7 }
  0x30   : > { %p542_p4 = por %p541_p3, %p540_p2 }
  0x32   : > { %p543_p6 = pnand %p542_p4, %p536_p13 }
  0x34   : > { %546 = shalt.err (!%p543_p6)
}
  0x35   : > { %s547_s9 = scalar_lea.vmem %s825_s14, 512  ;;  %s686_s23 = smov [#allocation4]  }
  0x36   : > { %p548_p9 = scmp.ne.s32.totalorder %s825_s14, %s547_s9  ;;  %s552_s17 = sshll.u32 %s686_s23, 4  ;;  %s553_s17 = int_to_ptr.vmem [resolvable:$false] %s552_s17 }
  0x37   : > { %s554_s27 = scalar_lea.vmem %s553_s17, 1024  ;;  %p555_p1 = scmp.lt.s32.totalorder %s825_s14, %s553_s17 }
  0x38   : > { %p550_p12 = pnand %p548_p9, %p534_p11  ;;  %p556_p7 = scmp.lt.s32.totalorder %s554_s27, %s547_s9 }
  0x3a   : > { %p551_p5 = pneg %p550_p12  ;;  %p557_p0 = por %p556_p7, %p555_p1 }
  0x3c   : > { %p558_p2 = pnand %p557_p0, %p551_p5 }
  0x3e   : > { %561 = shalt.err (!%p558_p2)
}
  0x3f   : > { %s687_s28 = smov 256   ;;  %s688_s18 = smov 128  }
  0x40   : > { %s689_s20 = smov 8   ;;  %p408_p11 = scmp.ge.s32.totalorder %s684_s16, 1 }
  0x41   : > { %428 = dma.hbm_to_vmem [thread:$0]  (!%p834_p8), %s830_s24, 512, %s825_s14, %s838_s19, %s687_s28, %s688_s18, %s689_s20  }
  0x42   : > { %p135_p13 = scmp.lt.s32.totalorder %s684_s16, 7 }
  0x44   : > { %p136_p3 = pnand %p408_p11, %p135_p13 }
  0x45   : > { %s141_s22 = sand.u32 (!%p136_p3), 1, %s660_s10  }
  0x46   : > { %139 = sbr.rel (%p136_p3) target bundleno = 868 (0x364), region = 24  ;;  %s409_s25 = sshll.u32 (!%p136_p3), %s141_s22, 5 }
  0x47   : > { %s142_s2 = scalar_lea.sflag (!%p136_p3), [#allocation5], %s141_s22  ;;  %s145_s3 = scalar_lea.vmem (!%p136_p3), [#allocation4], %s409_s25 }
  0x4d   : > { %635 = dma.done.wait (%p793_p10), %s142_s2, 512  }
  0x4e   : > { %637 = vsyncadd (%p793_p10), %s142_s2, 4294966784  ;;  %s161_s5 = sand.u32 1, %s648_s7   ;;  %p411_p1 = scmp.ge.s32.totalorder %s668_s12, 2 }
  0x4f   : > { %s410_s14 = sshll.u32 %s161_s5, 3  ;;  %v173_v0 = vld [vmem:[%s145_s3] sm:$0xff] (!%p411_p1)  ;;  %v174_v1 = vld [vmem:[%s145_s3 + $0x8] sm:$0xff] (!%p411_p1)  ;;  %v175_v2 = vld [vmem:[%s145_s3 + $0x10] sm:$0xff] (!%p411_p1)  ;;  %vm177_vm0 = vcmask (!%p411_p1), 130048   ;;  %p412_p10 = scmp.le.s32.totalorder (!%p411_p1), %s668_s12, 0 }
  0x50   : > { %s876_s24 = scalar_lea.vmem [#allocation7], %s410_s14  ;;  %172 = sbr.rel (%p411_p1) target bundleno = 464 (0x1d0), region = 32  ;;  %v176_v3 = vld [vmem:[%s145_s3 + $0x18] sm:$0xff] (!%p411_p1)  ;;  %v178_v4 = vsel (!%p411_p1), %vm177_vm0, %v173_v0, inf  ;;  %v179_v5 = vsel (!%p411_p1), %vm177_vm0, %v174_v1, inf  ;;  %v180_v6 = vsel (!%p411_p1), %vm177_vm0, %v175_v2, inf }
  0x51   : > { %v181_v7 = vsel (!%p411_p1), %vm177_vm0, %v176_v3, inf  ;;  %v182_v8 = vmin.f32 (!%p411_p1), %v178_v4, %v179_v5 }
  0x52   : > { %v183_v9 = vmin.f32 (!%p411_p1), %v180_v6, %v181_v7 }
  0x54   : > { %v184_v10 = vmin.f32 (!%p411_p1), %v182_v8, %v183_v9 }
  0x57   : > { %188 = sbr.rel (%p412_p10) target bundleno = 461 (0x1cd), region = 36  ;;  %p190_p5 = scmp.eq.s32.totalorder (!%p412_p10), %s668_s12, 1  ;;  %v196_v11 = vlaneseq (!%p412_p10)  ;;  %v189_v12 = vld [vmem:[#allocation2] sm:$0xff] (!%p412_p10)  ;;  %v191_v14 = vld [vmem:[#allocation3] sm:$0x1] (!%p412_p10)  ;;  %vm216_vm4 = vcmask (!%p412_p10), 1047680  }
  0x58   : > { %v200_v17 = vrot.slane (!%p412_p10), %v189_v12, 7  ;;  %v207_v18 = vrot.slane (!%p412_p10), %v189_v12, 1  ;;  %s690_s30 = smov (!%p412_p10), 16   ;;  %s691_s19 = smov (!%p412_p10), 113  }
  0x59   : > { %v197_v13 = vshrl.u32 (!%p412_p10), %v196_v11, 7  ;;  %s692_s9 = smov (!%p412_p10), 127   ;;  %v199_v30 = vand.u32 (!%p412_p10), 127, %v196_v11 }
  0x5b   : > { %v204_v16 = vsub.s32 (!%p412_p10), 0, %v197_v13  ;;  %vm201_vm2 = vcmp.eq.s32.totalorder (!%p412_p10), %v197_v13, 0  ;;  %vm208_vm3 = vcmp.eq.s32.totalorder (!%p412_p10), %v197_v13, 7  ;;  %vm223_vm5 = vcmp.eq.s32.totalorder (!%p412_p10), %v199_v30, 0 }
  0x5c   : > { %vm229_vm6 = vcmp.eq.s32.totalorder (!%p412_p10), %v199_v30, 15 }
  0x5d   : > { %v212_v20 = vrot.slane (!%p412_p10), %v184_v10, %v204_v16 }
  0x5e   : > { %s192_s29 = scalar_select %p190_p5, 1, 0 }
  0x5f   : > { %v213_v23 = vsel %vm208_vm3, %v212_v20, %v207_v18 }
  0x60   : > { %v193_v15 = vstv %s192_s29 }
  0x61   : > { %vm194_vm1 = vcmp.eq.s32.totalorder %v193_v15, 1 }
  0x62   : > { %v195_v19 = vsel %vm194_vm1, %v189_v12, %v191_v14 }
  0x63   : > { %v205_v21 = vrot.slane %v195_v19, %v204_v16 }
  0x65   : > { %v206_v22 = vsel %vm201_vm2, %v205_v21, %v200_v17 }
  0x66   : > { %v214_v24 = vmin.f32 %v189_v12, %v206_v22 }
  0x68   : > { %v215_v25 = vmin.f32 %v214_v24, %v213_v23 }
  0x6a   : > { %217 = vrot.lane.b32.xlu0 %v215_v25, %s690_s30 }
  0xdc   : > { %v218_v26 = vpop.permute.xlu0 %217 }
  0xdd   : > { %v219_v27 = vsel %vm216_vm4, %v218_v26, %v215_v25 }
  0xde   : > { %220 = vrot.lane.b32.xlu0 %v219_v27, %s690_s30 }
 0x150   : > { %v221_v28 = vpop.permute.xlu0 %220 }
 0x151   : > { %v222_v29 = vsel %vm216_vm4, %v221_v28, %v215_v25 }
 0x152   : > { %225 = vrot.lane.b32.xlu1 %v222_v29, %s691_s19 }
 0x156   : > { %230 = vrot.lane.b32.xlu1 %v222_v29, %s692_s9 }
 0x1c4   : > { %v226_v31 = vpop.permute.xlu1 %225 }
 0x1c5   : > { %v228_v32 = vsel %vm223_vm5, %v215_v25, %v226_v31 }
 0x1c6   : > { %v234_v33 = vmin.f32 %v215_v25, %v228_v32 }
 0x1c8   : > { %v231_v34 = vpop.permute.xlu1 %230 }
 0x1c9   : > { %v233_v35 = vsel %vm229_vm6, %v215_v25, %v231_v34 }
 0x1ca   : > { %v235_v36 = vmin.f32 %v234_v33, %v233_v35 }
 0x1cc   : > { %236 = vst.msk [vmem:[%s876_s24] sm:$0xff] %vm177_vm0, %v235_v36 }
 0x1cd PF: > { %v237_v37 = vld [vmem:[#allocation2 + $0x7] sm:$0x1]  ;;  %vm238_vm7 = vcmask 122880  }
 0x1ce   : > { %239 = vst.msk [vmem:[#allocation3] sm:$0x1] %vm238_vm7, %v237_v37 }
 0x1cf   : > { %240 = vst.msk [vmem:[#allocation2] sm:$0xff] %vm177_vm0, %v184_v10 }
 0x1d0 PF: > { %p413_p8 = scmp.ne.s32.totalorder %s668_s12, 2 }
 0x1d1   : > { %p247_p4 = scmp.eq.s32.totalorder (!%p413_p8), %s668_s12, 1  ;;  %v253_v38 = vlaneseq (!%p413_p8)  ;;  %s693_s17 = smov (!%p413_p8), 16   ;;  %vm273_vm11 = vcmask (!%p413_p8), 1047680   ;;  %vm293_vm14 = vcmask (!%p413_p8), 130048  }
 0x1d2   : > { %244 = sbr.rel (%p413_p8) target bundleno = 840 (0x348), region = 40  ;;  %s694_s27 = smov (!%p413_p8), 113  }
 0x1d3   : > { %v254_v40 = vshrl.u32 (!%p413_p8), %v253_v38, 7  ;;  %s695_s28 = smov (!%p413_p8), 127   ;;  %v256_v57 = vand.u32 (!%p413_p8), 127, %v253_v38 }
 0x1d5   : > { %v248_v41 = vld [vmem:[#allocation3] sm:$0x1] (!%p413_p8)  ;;  %v261_v43 = vsub.s32 (!%p413_p8), 0, %v254_v40  ;;  %vm258_vm9 = vcmp.eq.s32.totalorder (!%p413_p8), %v254_v40, 0  ;;  %vm265_vm10 = vcmp.eq.s32.totalorder (!%p413_p8), %v254_v40, 7  ;;  %vm280_vm12 = vcmp.eq.s32.totalorder (!%p413_p8), %v256_v57, 0 }
 0x1d6   : > { %v246_v39 = vld [vmem:[#allocation2] sm:$0xff] (!%p413_p8)  ;;  %vm286_vm13 = vcmp.eq.s32.totalorder (!%p413_p8), %v256_v57, 15 }
 0x1d7   : > { %v257_v44 = vrot.slane (!%p413_p8), %v246_v39, 7  ;;  %v264_v45 = vrot.slane (!%p413_p8), %v246_v39, 1  ;;  %v414_v46 = vld [vmem:[#allocation2 + $0x7] ss:$0 sm:$0xff] (!%p413_p8) }
 0x1d9   : > { %s249_s23 = scalar_select %p247_p4, 1, 0  ;;  %v270_v50 = vsel %vm265_vm10, %v414_v46, %v264_v45 }
 0x1db   : > { %v250_v42 = vstv %s249_s23 }
 0x1dc   : > { %vm251_vm8 = vcmp.eq.s32.totalorder %v250_v42, 1 }
 0x1dd   : > { %v252_v47 = vsel %vm251_vm8, %v246_v39, %v248_v41 }
 0x1de   : > { %v262_v48 = vrot.slane %v252_v47, %v261_v43 }
 0x1e0   : > { %v263_v49 = vsel %vm258_vm9, %v262_v48, %v257_v44 }
 0x1e1   : > { %v271_v51 = vmin.f32 %v246_v39, %v263_v49 }
 0x1e3   : > { %v272_v52 = vmin.f32 %v271_v51, %v270_v50 }
 0x1e5   : > { %274 = vrot.lane.b32.xlu0 %v272_v52, %s693_s17 }
 0x257   : > { %v275_v53 = vpop.permute.xlu0 %274 }
 0x258   : > { %v276_v54 = vsel %vm273_vm11, %v275_v53, %v272_v52 }
 0x259   : > { %277 = vrot.lane.b32.xlu0 %v276_v54, %s693_s17 }
 0x2cb   : > { %v278_v55 = vpop.permute.xlu0 %277 }
 0x2cc   : > { %v279_v56 = vsel %vm273_vm11, %v278_v55, %v272_v52 }
 0x2cd   : > { %282 = vrot.lane.b32.xlu1 %v279_v56, %s694_s27 }
 0x2d1   : > { %287 = vrot.lane.b32.xlu1 %v279_v56, %s695_s28 }
 0x33f   : > { %v283_v58 = vpop.permute.xlu1 %282 }
 0x340   : > { %v285_v59 = vsel %vm280_vm12, %v272_v52, %v283_v58 }
 0x341   : > { %v291_v60 = vmin.f32 %v272_v52, %v285_v59 }
 0x343   : > { %v288_v61 = vpop.permute.xlu1 %287 }
 0x344   : > { %v290_v62 = vsel %vm286_vm13, %v272_v52, %v288_v61 }
 0x345   : > { %v292_v63 = vmin.f32 %v291_v60, %v290_v62 }
 0x347   : > { %294 = vst.msk [vmem:[%s876_s24] sm:$0xff] %vm293_vm14, %v292_v63 }
 0x348 PF: > { %s416_s18 = sadd.s32 4294967295, %s668_s12  ;;  %s417_s20 = sshll.u32 %s672_s13, 1 }
 0x349   : > { %p304_p6 = scmp.gt.s32.totalorder %s416_s18, 0  ;;  %s314_s22 = sshll.u32 %s876_s24, 4  ;;  %s894_s22 = int_to_ptr.vmem [resolvable:$true] %s314_s22 }
 0x34a   : > { %s296_s30 = scalar_lea.sflag [#allocation6], %s161_s5  ;;  %s562_s19 = scalar_lea.vmem %s894_s22, 128 }
 0x34b   : > { %s994_s18 = smov (!%p304_p6, %s416_s18), 0  ;;  %p563_p9 = scmp.ne.s32.totalorder %s894_s22, %s562_s19 }
 0x34c   : > { %s310_s25 = sadd.s32 %s417_s20, %s994_s18  ;;  %p969_p12 = scmp.ne.s32.totalorder %s966_s4, 0 }
 0x34d   : > { %s418_s2 = sshll.u32 %s310_s25, 7  ;;  %s696_s12 = smov [#allocation7]  }
 0x34e   : > { %s312_s29 = scalar_lea.hbm %s955_s1, %s418_s2  ;;  %p564_p7 = pnand %p563_p9, %p969_p12 }
 0x34f   : > { %s566_s13 = sshll.u32 %s696_s12, 4  ;;  %s567_s13 = int_to_ptr.vmem [resolvable:$false] %s566_s13 }
 0x350   : > { %p565_p0 = pneg %p564_p7  ;;  %s568_s24 = scalar_lea.vmem %s567_s13, 256 }
 0x351   : > { %p569_p2 = scmp.lt.s32.totalorder %s894_s22, %s567_s13  ;;  %p570_p11 = scmp.lt.s32.totalorder %s568_s24, %s562_s19 }
 0x353   : > { %p571_p13 = por %p570_p11, %p569_p2 }
 0x355   : > { %p572_p3 = pnand %p571_p13, %p565_p0 }
 0x357   : > { %575 = shalt.err (!%p572_p3)
}
 0x358   : > { %s576_s9 = scalar_lea.hbm %s312_s29, 128  ;;  %s580_s17 = scalar_lea.hbm %s955_s1, 512 }
 0x359   : > { %p577_p1 = scmp.ne.s32.totalorder %s312_s29, %s576_s9  ;;  %p581_p8 = scmp.lt.u32.totalorder %s312_s29, %s955_s1 }
 0x35a   : > { %p582_p4 = scmp.lt.u32.totalorder %s580_s17, %s576_s9  ;;  %p584_p9 = scmp.lt.u32.totalorder %s576_s9, %s312_s29 }
 0x35b   : > { %p578_p10 = pnand %p577_p1, %p969_p12 }
 0x35c   : > { %p583_p6 = por %p582_p4, %p581_p8 }
 0x35d   : > { %p579_p5 = pneg %p578_p10 }
 0x35e   : > { %p585_p7 = por %p584_p9, %p583_p6 }
 0x360   : > { %p586_p0 = pnand %p585_p7, %p579_p5 }
 0x362   : > { %589 = shalt.err (!%p586_p0)
}
 0x363   : > { %423 = dma.vmem_to_hbm [thread:$0]  (%p969_p12), %s894_s22, 128, %s312_s29, %s296_s30  }
 0x364 PF: > { %p434_p2 = scmp.ge.s32.totalorder %s684_s16, 2  ;;  %s326_s18 = sand.u32 1, %s644_s6  }
 0x365   : > { %p970_p11 = scmp.ne.s32.totalorder %s967_s21, 0  ;;  %s327_s20 = scalar_lea.sflag [#allocation6], %s326_s18 }
 0x367   : > { %p430_p13 = pnand %p434_p2, %p970_p11 }
 0x369   : > { %639 = dma.done.wait (!%p430_p13), %s327_s20, 128  }
 0x36a   : > { %641 = vsyncadd (!%p430_p13), %s327_s20, 4294967168  ;;  %s17_s16 = sadd.s32 1, %s684_s16   ;;  %s971_s4 = sld [smem:[#allocation13_spill]] }
 0x36b   : > { %p14_p3 = scmp.ge.s32.totalorder %s17_s16, 8   ;;  %s972_s12 = sld [smem:[#allocation10_spill]] }
 0x36c   : > { %s973_s14 = sld [smem:[#allocation11_spill]]  ;;  %s974_s22 = sld [smem:[#allocation12_spill]] }
 0x36d   : > { %s975_s6 = smov %s648_s7  ;;  %s976_s7 = smov %s652_s8 }
 0x36e   : > { %s977_s8 = smov %s821_s26  ;;  %s978_s9 = smov %s660_s10 }
 0x36f   : > { %s979_s10 = smov %s664_s11  ;;  %s981_s13 = smov %s680_s15 }
 0x370   : > { %s980_s11 = smov %s971_s4  ;;  %16 = sbr.rel (!%p14_p3) target bundleno = 9 (0x9), region = 81 }
 0x372   : > { %s982_s15 = smov %s974_s22 }
 0x377   :  { %332 = vsyncpa [#allocation5], 1 }
 0x378   :  { %334 = vsyncpa [#allocation5 + $0x1], 1 }
 0x379   :  { %335 = vsyncpa [#allocation6], 1 }
 0x37a   :  { %337 = vsyncpa [#allocation6 + $0x1], 1 }

</bundles_post_ra>
